<compile_context>
chip_gen: v7x
topology: tpu7x:2x2x1
jax: 0.10.0
libtpu: 0.0.40
codegen_flags: <defaults>
</compile_context>

<pallas_src>
import functools

import jax
import jax.numpy as jnp
import numpy as np
from jax.experimental import pallas as pl
from jax.experimental.pallas import tpu as pltpu


_LANE_TILE_CANDIDATES = (1024, 512, 256, 128)


def _pick_lane_tile(hw):
    for t in _LANE_TILE_CANDIDATES:
        if hw % t == 0:
            return t
    # Fallback: a single full-extent block is always layout-legal and guarantees no
    # padded garbage leaks into the sum.
    return hw


def _regloss_kernel(t0_ref, p0_ref,
                    bt1_ref, bt2_ref, bt3_ref, bt4_ref,
                    bp1_ref, bp2_ref, bp3_ref, bp4_ref,
                    out_ref, acc_ref, *, inv_n):
    step = pl.program_id(0)

    @pl.when(step == 0)
    def _():
        acc_ref[0] = 0.0

    t0 = t0_ref[...].astype(jnp.float32)
    p0 = p0_ref[...].astype(jnp.float32)

    # Objectness terms.
    no_obj = ((1.0 - t0) * p0) ** 2
    obj = (t0 * (p0 - 1.0)) ** 2

    # Box regression term: explicit VPU adds over the 4 channels (no sublane reduce).
    d1 = bt1_ref[...].astype(jnp.float32) - bp1_ref[...].astype(jnp.float32)
    d2 = bt2_ref[...].astype(jnp.float32) - bp2_ref[...].astype(jnp.float32)
    d3 = bt3_ref[...].astype(jnp.float32) - bp3_ref[...].astype(jnp.float32)
    d4 = bt4_ref[...].astype(jnp.float32) - bp4_ref[...].astype(jnp.float32)
    box = t0 * (d1 * d1 + d2 * d2 + d3 * d3 + d4 * d4)

    # Single fused reduction per tile (one XLU reduce instead of three full means).
    acc_ref[0] += jnp.sum(no_obj + obj + box)

    @pl.when(step == pl.num_programs(0) - 1)
    def _():
        out_ref[0, 0] = acc_ref[0] * inv_n


def regloss(y_true, y_pred, *, lane_tile=None):
    """y_true, y_pred: (B, 5, H, W) float arrays. Returns scalar float32 loss."""
    B, C, H, W = y_true.shape
    assert C == 5 and y_pred.shape == y_true.shape
    HW = H * W
    N = B * HW
    inv_n = 1.0 / float(N)

    yt = y_true.reshape(B, C, HW)
    yp = y_pred.reshape(B, C, HW)

    # Lane-dense, per-channel 2-D inputs (channel split lives in the wrapper, not the
    # kernel, so no sublane-strided slicing / relayout copies inside the kernel).
    inputs = (
        yt[:, 0], yp[:, 0],                        # objectness target / prediction
        yt[:, 1], yt[:, 2], yt[:, 3], yt[:, 4],    # box targets
        yp[:, 1], yp[:, 2], yp[:, 3], yp[:, 4],    # box predictions
    )

    if lane_tile is None:
        lane_tile = _pick_lane_tile(HW)
    assert HW % lane_tile == 0 and (lane_tile % 128 == 0 or lane_tile == HW)
    grid = (HW // lane_tile,)

    in_spec = pl.BlockSpec((B, lane_tile), lambda j: (0, j))

    itemsize = jnp.dtype(y_true.dtype).itemsize
    cost = pl.CostEstimate(
        flops=14 * N,
        transcendentals=0,
        bytes_accessed=10 * N * itemsize + 4,
    )

    out = pl.pallas_call(
        functools.partial(_regloss_kernel, inv_n=inv_n),
        out_shape=jax.ShapeDtypeStruct((1, 1), jnp.float32),
        grid_spec=pltpu.PrefetchScalarGridSpec(
            num_scalar_prefetch=0,
            grid=grid,
            in_specs=[in_spec] * 10,
            out_specs=pl.BlockSpec(memory_space=pltpu.SMEM),
            scratch_shapes=[pltpu.SMEM((1,), jnp.float32)],
        ),
        compiler_params=pltpu.CompilerParams(
            dimension_semantics=("arbitrary",),   # reduction axis
            vmem_limit_bytes=32 * 1024 * 1024,    # explicit budget; safe on v5e/v6e/v7x
        ),
        cost_estimate=cost,
    )(*inputs)
    return out[0, 0]


def regloss_ref(y_true, y_pred):
    t0 = y_true[:, 0]
    p0 = y_pred[:, 0]
    no_object_loss = jnp.mean(((1.0 - t0) * p0) ** 2)
    object_loss = jnp.mean((t0 * (p0 - 1.0)) ** 2)
    reg_loss = jnp.mean(t0 * jnp.sum((y_true[:, 1:5] - y_pred[:, 1:5]) ** 2, axis=1))
    return no_object_loss + object_loss + reg_loss


if __name__ == "__main__":
    key = jax.random.PRNGKey(0)
    k1, k2, k3 = jax.random.split(key, 3)

    B, C, H, W = 2, 5, 16, 16
    # objectness target in {0, 1}, box targets / predictions are arbitrary floats
    obj_t = jax.random.bernoulli(k1, 0.3, (B, 1, H, W)).astype(jnp.float32)
    box_t = jax.random.normal(k2, (B, 4, H, W), dtype=jnp.float32)
    y_true = jnp.concatenate([obj_t, box_t], axis=1)                  # (2, 5, 16, 16)
    y_pred = jax.random.normal(k3, (B, C, H, W), dtype=jnp.float32)   # (2, 5, 16, 16)

    ref = jax.block_until_ready(regloss_ref(y_true, y_pred))

    # Default tiling (demo shape H*W=256 -> a single 256-lane block).
    loss = jax.block_until_ready(regloss(y_true, y_pred))
    np.testing.assert_allclose(np.asarray(loss), np.asarray(ref), rtol=1e-5, atol=1e-6)

    # Force a multi-step grid (128-lane tiles -> 2 steps) to exercise the SMEM
    # accumulator init / accumulate / finalize path.
    loss_tiled = jax.block_until_ready(regloss(y_true, y_pred, lane_tile=128))
    np.testing.assert_allclose(np.asarray(loss_tiled), np.asarray(ref),
                               rtol=1e-5, atol=1e-6)

    print("KERNEL_OK")
</pallas_src>

<mosaic_0001>
module attributes {stable_mosaic.version = 11 : i64} {
  func.func @_regloss_kernel(%arg0: i32, %arg1: memref<2x256xf32, #tpu.memory_space<vmem>>, %arg2: memref<2x256xf32, #tpu.memory_space<vmem>>, %arg3: memref<2x256xf32, #tpu.memory_space<vmem>>, %arg4: memref<2x256xf32, #tpu.memory_space<vmem>>, %arg5: memref<2x256xf32, #tpu.memory_space<vmem>>, %arg6: memref<2x256xf32, #tpu.memory_space<vmem>>, %arg7: memref<2x256xf32, #tpu.memory_space<vmem>>, %arg8: memref<2x256xf32, #tpu.memory_space<vmem>>, %arg9: memref<2x256xf32, #tpu.memory_space<vmem>>, %arg10: memref<2x256xf32, #tpu.memory_space<vmem>>, %arg11: memref<1x1xf32, #tpu.memory_space<smem>>, %arg12: memref<1xf32, #tpu.memory_space<smem>>) attributes {dimension_semantics = [#tpu.dimension_semantics<arbitrary>], iteration_bounds = array<i64: 1>, scalar_prefetch = 0 : i64, scratch_operands = 1 : i64, tpu.core_type = #tpu.core_type<tc>, window_params = [{transform_indices = @transform_0, window_bounds = array<i64: 2, 256>}, {transform_indices = @transform_1, window_bounds = array<i64: 2, 256>}, {transform_indices = @transform_2, window_bounds = array<i64: 2, 256>}, {transform_indices = @transform_3, window_bounds = array<i64: 2, 256>}, {transform_indices = @transform_4, window_bounds = array<i64: 2, 256>}, {transform_indices = @transform_5, window_bounds = array<i64: 2, 256>}, {transform_indices = @transform_6, window_bounds = array<i64: 2, 256>}, {transform_indices = @transform_7, window_bounds = array<i64: 2, 256>}, {transform_indices = @transform_8, window_bounds = array<i64: 2, 256>}, {transform_indices = @transform_9, window_bounds = array<i64: 2, 256>}, {transform_indices = @transform_10, window_bounds = array<i64: 1, 1>}]} {
    %c0_i32 = arith.constant 0 : i32
    %0 = arith.cmpi eq, %arg0, %c0_i32 : i32
    %1 = arith.extui %0 : i1 to i32
    %c0_i32_0 = arith.constant 0 : i32
    %2 = arith.cmpi ne, %1, %c0_i32_0 : i32
    scf.if %2 {
      %cst_26 = arith.constant 0.000000e+00 : f32
      %c0_27 = arith.constant 0 : index
      %45 = memref.load %arg12[%c0_27] : memref<1xf32, #tpu.memory_space<smem>>
      memref.store %cst_26, %arg12[%c0_27] : memref<1xf32, #tpu.memory_space<smem>>
    } else {
    }
    %c0 = arith.constant 0 : index
    %c0_1 = arith.constant 0 : index
    %3 = vector.load %arg1[%c0, %c0_1] : memref<2x256xf32, #tpu.memory_space<vmem>>, vector<2x256xf32>
    %c0_2 = arith.constant 0 : index
    %c0_3 = arith.constant 0 : index
    %4 = vector.load %arg2[%c0_2, %c0_3] : memref<2x256xf32, #tpu.memory_space<vmem>>, vector<2x256xf32>
    %cst = arith.constant 1.000000e+00 : f32
    %5 = vector.broadcast %cst : f32 to vector<2x256xf32>
    %6 = arith.subf %5, %3 : vector<2x256xf32>
    %7 = arith.mulf %6, %4 : vector<2x256xf32>
    %8 = arith.mulf %7, %7 : vector<2x256xf32>
    %cst_4 = arith.constant 1.000000e+00 : f32
    %9 = vector.broadcast %cst_4 : f32 to vector<2x256xf32>
    %10 = arith.subf %4, %9 : vector<2x256xf32>
    %11 = arith.mulf %3, %10 : vector<2x256xf32>
    %12 = arith.mulf %11, %11 : vector<2x256xf32>
    %c0_5 = arith.constant 0 : index
    %c0_6 = arith.constant 0 : index
    %13 = vector.load %arg3[%c0_5, %c0_6] : memref<2x256xf32, #tpu.memory_space<vmem>>, vector<2x256xf32>
    %c0_7 = arith.constant 0 : index
    %c0_8 = arith.constant 0 : index
    %14 = vector.load %arg7[%c0_7, %c0_8] : memref<2x256xf32, #tpu.memory_space<vmem>>, vector<2x256xf32>
    %15 = arith.subf %13, %14 : vector<2x256xf32>
    %c0_9 = arith.constant 0 : index
    %c0_10 = arith.constant 0 : index
    %16 = vector.load %arg4[%c0_9, %c0_10] : memref<2x256xf32, #tpu.memory_space<vmem>>, vector<2x256xf32>
    %c0_11 = arith.constant 0 : index
    %c0_12 = arith.constant 0 : index
    %17 = vector.load %arg8[%c0_11, %c0_12] : memref<2x256xf32, #tpu.memory_space<vmem>>, vector<2x256xf32>
    %18 = arith.subf %16, %17 : vector<2x256xf32>
    %c0_13 = arith.constant 0 : index
    %c0_14 = arith.constant 0 : index
    %19 = vector.load %arg5[%c0_13, %c0_14] : memref<2x256xf32, #tpu.memory_space<vmem>>, vector<2x256xf32>
    %c0_15 = arith.constant 0 : index
    %c0_16 = arith.constant 0 : index
    %20 = vector.load %arg9[%c0_15, %c0_16] : memref<2x256xf32, #tpu.memory_space<vmem>>, vector<2x256xf32>
    %21 = arith.subf %19, %20 : vector<2x256xf32>
    %c0_17 = arith.constant 0 : index
    %c0_18 = arith.constant 0 : index
    %22 = vector.load %arg6[%c0_17, %c0_18] : memref<2x256xf32, #tpu.memory_space<vmem>>, vector<2x256xf32>
    %c0_19 = arith.constant 0 : index
    %c0_20 = arith.constant 0 : index
    %23 = vector.load %arg10[%c0_19, %c0_20] : memref<2x256xf32, #tpu.memory_space<vmem>>, vector<2x256xf32>
    %24 = arith.subf %22, %23 : vector<2x256xf32>
    %25 = arith.mulf %15, %15 : vector<2x256xf32>
    %26 = arith.mulf %18, %18 : vector<2x256xf32>
    %27 = arith.addf %25, %26 : vector<2x256xf32>
    %28 = arith.mulf %21, %21 : vector<2x256xf32>
    %29 = arith.addf %27, %28 : vector<2x256xf32>
    %30 = arith.mulf %24, %24 : vector<2x256xf32>
    %31 = arith.addf %29, %30 : vector<2x256xf32>
    %32 = arith.mulf %3, %31 : vector<2x256xf32>
    %c0_21 = arith.constant 0 : index
    %33 = memref.load %arg12[%c0_21] : memref<1xf32, #tpu.memory_space<smem>>
    %34 = arith.addf %8, %12 : vector<2x256xf32>
    %35 = arith.addf %34, %32 : vector<2x256xf32>
    %36 = vector.shape_cast %35 : vector<2x256xf32> to vector<1x2x256xf32>
    %cst_22 = arith.constant dense<0.000000e+00> : vector<1xf32>
    %37 = vector.multi_reduction <add>, %36, %cst_22 [1, 2] : vector<1x2x256xf32> to vector<1xf32>
    %38 = vector.shape_cast %37 : vector<1xf32> to vector<1x1x1xf32>
    %39 = vector.extract %38[0, 0, 0] : f32 from vector<1x1x1xf32>
    %40 = arith.addf %33, %39 : f32
    %c0_23 = arith.constant 0 : index
    %41 = memref.load %arg12[%c0_23] : memref<1xf32, #tpu.memory_space<smem>>
    memref.store %40, %arg12[%c0_23] : memref<1xf32, #tpu.memory_space<smem>>
    %c0_i32_24 = arith.constant 0 : i32
    %42 = arith.cmpi eq, %arg0, %c0_i32_24 : i32
    %43 = arith.extui %42 : i1 to i32
    %c0_i32_25 = arith.constant 0 : i32
    %44 = arith.cmpi ne, %43, %c0_i32_25 : i32
    scf.if %44 {
      %c0_26 = arith.constant 0 : index
      %45 = memref.load %arg12[%c0_26] : memref<1xf32, #tpu.memory_space<smem>>
      %cst_27 = arith.constant 0.001953125 : f32
      %46 = arith.mulf %45, %cst_27 : f32
      %c0_28 = arith.constant 0 : index
      %c0_29 = arith.constant 0 : index
      %47 = memref.load %arg11[%c0_28, %c0_29] : memref<1x1xf32, #tpu.memory_space<smem>>
      memref.store %46, %arg11[%c0_28, %c0_29] : memref<1x1xf32, #tpu.memory_space<smem>>
    } else {
    }
    return
  }
  func.func @transform_0(%arg0: i32) -> (i32, i32) {
    %c0_i32 = arith.constant 0 : i32
    %c0_i32_0 = arith.constant 0 : i32
    return %c0_i32, %arg0 : i32, i32
  }
  func.func @transform_1(%arg0: i32) -> (i32, i32) {
    %c0_i32 = arith.constant 0 : i32
    %c0_i32_0 = arith.constant 0 : i32
    return %c0_i32, %arg0 : i32, i32
  }
  func.func @transform_2(%arg0: i32) -> (i32, i32) {
    %c0_i32 = arith.constant 0 : i32
    %c0_i32_0 = arith.constant 0 : i32
    return %c0_i32, %arg0 : i32, i32
  }
  func.func @transform_3(%arg0: i32) -> (i32, i32) {
    %c0_i32 = arith.constant 0 : i32
    %c0_i32_0 = arith.constant 0 : i32
    return %c0_i32, %arg0 : i32, i32
  }
  func.func @transform_4(%arg0: i32) -> (i32, i32) {
    %c0_i32 = arith.constant 0 : i32
    %c0_i32_0 = arith.constant 0 : i32
    return %c0_i32, %arg0 : i32, i32
  }
  func.func @transform_5(%arg0: i32) -> (i32, i32) {
    %c0_i32 = arith.constant 0 : i32
    %c0_i32_0 = arith.constant 0 : i32
    return %c0_i32, %arg0 : i32, i32
  }
  func.func @transform_6(%arg0: i32) -> (i32, i32) {
    %c0_i32 = arith.constant 0 : i32
    %c0_i32_0 = arith.constant 0 : i32
    return %c0_i32, %arg0 : i32, i32
  }
  func.func @transform_7(%arg0: i32) -> (i32, i32) {
    %c0_i32 = arith.constant 0 : i32
    %c0_i32_0 = arith.constant 0 : i32
    return %c0_i32, %arg0 : i32, i32
  }
  func.func @transform_8(%arg0: i32) -> (i32, i32) {
    %c0_i32 = arith.constant 0 : i32
    %c0_i32_0 = arith.constant 0 : i32
    return %c0_i32, %arg0 : i32, i32
  }
  func.func @transform_9(%arg0: i32) -> (i32, i32) {
    %c0_i32 = arith.constant 0 : i32
    %c0_i32_0 = arith.constant 0 : i32
    return %c0_i32, %arg0 : i32, i32
  }
  func.func @transform_10(%arg0: i32) -> (i32, i32) {
    %c0_i32 = arith.constant 0 : i32
    %c0_i32_0 = arith.constant 0 : i32
    %c0_i32_1 = arith.constant 0 : i32
    return %c0_i32, %c0_i32_0 : i32, i32
  }
}

</mosaic_0001>

<bundles_post_ra>
// kernel: tpu_custom_call.1
= control target key start
LH: loop header
LB: loop body
LE: loop exit
PB: predicated region body
PF: predicated region fallthrough
CT: control target
= control target key end

     0   :  { %15 = vsyncpa [#allocation4], 0  ;;  %s332_s0 = inlined_call_operand.hbm [shape: f32[2,256], index: 0, kind: input, shape index: {}]   ;;  %s333_s1 = inlined_call_operand.hbm [shape: f32[2,256], index: 1, kind: input, shape index: {}]   ;;  %s334_s2 = inlined_call_operand.vmem [shape: f32[2,256], index: 2, kind: input, shape index: {}]   ;;  %s335_s3 = inlined_call_operand.vmem [shape: f32[2,256], index: 3, kind: input, shape index: {}]   ;;  %s336_s4 = inlined_call_operand.vmem [shape: f32[2,256], index: 4, kind: input, shape index: {}]   ;;  %s337_s5 = inlined_call_operand.vmem [shape: f32[2,256], index: 5, kind: input, shape index: {}]   ;;  %s338_s6 = inlined_call_operand.vmem [shape: f32[2,256], index: 6, kind: input, shape index: {}]   ;;  %s339_s7 = inlined_call_operand.vmem [shape: f32[2,256], index: 7, kind: input, shape index: {}]   ;;  %s340_s8 = inlined_call_operand.vmem [shape: f32[2,256], index: 8, kind: input, shape index: {}]   ;;  %s341_s9 = inlined_call_operand.vmem [shape: f32[2,256], index: 9, kind: input, shape index: {}]   ;;  %s342_s10 = inlined_call_operand.hbm [shape: f32[1,1], index: 10, kind: output, shape index: {}]  }
   0x1   :  { %16 = vsyncpa [#allocation7], 0 }
   0x2   :  { %17 = vsyncpa [#allocation5], 0  ;;  %s213_s13 = smov [#allocation3]   ;;  %s214_s15 = smov [#allocation6]  }
   0x3   :  { %s24_s14 = sshll.u32 %s213_s13, 4  ;;  %s34_s16 = sshll.u32 %s214_s15, 4  ;;  %s25_s14 = int_to_ptr.vmem [resolvable:$true] %s24_s14  ;;  %s35_s16 = int_to_ptr.vmem [resolvable:$true] %s34_s16 }
   0x4   :  { %s153_s19 = scalar_lea.hbm %s332_s0, 64 }
   0x5   :  { %p154_p0 = scmp.ne.s32.totalorder %s332_s0, %s153_s19  ;;  %p157_p1 = scmp.lt.u32.totalorder %s153_s19, %s332_s0 }
   0x7   :  { %p159_p2 = pnand %p157_p1, %p154_p0 }
   0x9   :  { %162 = shalt.err (!%p159_p2)
}
   0xa   :  { %s163_s24 = scalar_lea.vmem %s25_s14, 64  ;;  %p168_p4 = scmp.lt.s32.totalorder %s25_s14, %s25_s14 }
   0xb   :  { %p164_p3 = scmp.ne.s32.totalorder %s25_s14, %s163_s24  ;;  %p169_p5 = scmp.lt.s32.totalorder %s163_s24, %s163_s24 }
   0xd   :  { %p170_p6 = por %p169_p5, %p168_p4 }
   0xf   :  { %p171_p7 = pnand %p170_p6, %p164_p3 }
  0x11   :  { %174 = shalt.err (!%p171_p7)
}
  0x12   :  { %27 = dma.hbm_to_vmem [thread:$0]  %s332_s0, 64, %s25_s14, [#allocation4]  }
  0x13   :  { %s175_s29 = scalar_lea.hbm %s333_s1, 64 }
  0x14   :  { %p176_p8 = scmp.ne.s32.totalorder %s333_s1, %s175_s29  ;;  %p179_p9 = scmp.lt.u32.totalorder %s175_s29, %s333_s1 }
  0x16   :  { %p181_p10 = pnand %p179_p9, %p176_p8 }
  0x18   :  { %184 = shalt.err (!%p181_p10)
}
  0x19   :  { %s185_s15 = scalar_lea.vmem %s35_s16, 64  ;;  %p190_p12 = scmp.lt.s32.totalorder %s35_s16, %s35_s16 }
  0x1a   :  { %p186_p11 = scmp.ne.s32.totalorder %s35_s16, %s185_s15  ;;  %p191_p13 = scmp.lt.s32.totalorder %s185_s15, %s185_s15 }
  0x1c   :  { %p192_p0 = por %p191_p13, %p190_p12 }
  0x1e   :  { %p193_p1 = pnand %p192_p0, %p186_p11 }
  0x20   :  { %196 = shalt.err (!%p193_p1)
}
  0x21   :  { %37 = dma.hbm_to_vmem [thread:$0]  %s333_s1, 64, %s35_s16, [#allocation7]  }
  0x22   :  { %207 = dma.done.wait [#allocation4], 64  }
  0x23   :  { %208 = vsyncadd [#allocation4], 4294967232 }
  0x24   :  { %209 = dma.done.wait [#allocation7], 64  }
  0x25   :  { %210 = vsyncadd [#allocation7], 4294967232  ;;  %v66_v0 = vld [vmem:[#allocation3] sm:$0xf]  ;;  %v67_v1 = vld [vmem:[#allocation6] sm:$0xf]  ;;  %v101_v23 = vlaneseq }
  0x26   :  { %v74_v2 = vld [vmem:[%s334_s2] sm:$0xf]  ;;  %v68_v3 = vsub.f32 1.0, %v66_v0  ;;  %v146_v4 = vadd.f32 -1.0, %v67_v1  ;;  %v215_v21 = vmov 1983009808  }
  0x27   :  { %v75_v5 = vld [vmem:[%s338_s6] sm:$0xf]  ;;  %v99_v22 = vunpack.c.l.s4 %v215_v21  ;;  %v102_v30 = vshrl.u32 %v101_v23, 7  ;;  %vm108_vm0 = vcmask 1041408  }
  0x28   :  { %v77_v6 = vld [vmem:[%s335_s3] sm:$0xf]  ;;  %v76_v7 = vsub.f32 %v74_v2, %v75_v5  ;;  %v69_v11 = vmul.f32 %v68_v3, %v67_v1  ;;  %v72_v12 = vmul.f32 %v146_v4, %v66_v0 }
  0x29   :  { %v78_v8 = vld [vmem:[%s339_s7] sm:$0xf]  ;;  %v100_v29 = vunpack.c.0.s8 %v99_v22 }
  0x2a   :  { %v80_v9 = vld [vmem:[%s336_s4] sm:$0xf]  ;;  %v79_v13 = vsub.f32 %v77_v6, %v78_v8  ;;  %v86_v18 = vmul.f32 %v76_v7, %v76_v7  ;;  %v70_v24 = vmul.f32 %v69_v11, %v69_v11  ;;  %v73_v25 = vmul.f32 %v72_v12, %v72_v12 }
  0x2b   :  { %v81_v10 = vld [vmem:[%s340_s8] sm:$0xf]  ;;  %v103_v34 = vsub.s32 %v100_v29, %v102_v30 }
  0x2c   :  { %v82_v14 = vsub.f32 %v80_v9, %v81_v10  ;;  %v83_v15 = vld [vmem:[%s337_s5] sm:$0xf]  ;;  %v87_v19 = vmul.f32 %v79_v13, %v79_v13  ;;  %v95_v32 = vadd.f32 %v73_v25, %v70_v24 }
  0x2d   :  { %v84_v16 = vld [vmem:[%s341_s9] sm:$0xf]  ;;  %s197_s9 = scalar_lea.hbm %s342_s10, 16 }
  0x2e   :  { %v85_v17 = vsub.f32 %v83_v15, %v84_v16  ;;  %v89_v20 = vmul.f32 %v82_v14, %v82_v14  ;;  %v88_v26 = vadd.f32 %v87_v19, %v86_v18  ;;  %p198_p2 = scmp.ne.s32.totalorder %s342_s10, %s197_s9  ;;  %p201_p3 = scmp.lt.u32.totalorder %s197_s9, %s342_s10 }
  0x30   :  { %v91_v27 = vmul.f32 %v85_v17, %v85_v17  ;;  %v90_v28 = vadd.f32 %v89_v20, %v88_v26  ;;  %p203_p4 = pnand %p201_p3, %p198_p2 }
  0x32   :  { %v92_v31 = vadd.f32 %v91_v27, %v90_v28 }
  0x34   :  { %v93_v33 = vmul.f32 %v92_v31, %v66_v0 }
  0x36   :  { %v96_v35 = vadd.f32 %v95_v32, %v93_v33 }
  0x38   :  { %v104_v36 = vrot.slane %v96_v35, %v103_v34 }
  0x3a   :  { %v105_v37 = vcombine.high %v104_v36, %v104_v36  ;;  %v109_v38 = vsel %vm108_vm0, %v104_v36, 0.0 }
  0x3c   :  { %v110_v39 = vsel %vm108_vm0, %v105_v37, 0.0 }
  0x3d   :  { %v111_v40 = vadd.f32 %v110_v39, %v109_v38 }
  0x3f   :  { %112 = vadd.xlane.f32.xlu0 %v111_v40 }
  0xcc   :  { %v113_v41 = vpop.xlane.xlu0 %112 }
  0xcd   :  { %v114_v42 = vrot.slane %v113_v41, 4 }
  0xcf   :  { %v115_v43 = vadd.f32 %v114_v42, %v113_v41 }
  0xd1   :  { %v116_v44 = vrot.slane %v115_v43, 2 }
  0xd3   :  { %v117_v45 = vadd.f32 %v116_v44, %v115_v43 }
  0xd5   :  { %v118_v46 = vrot.slane %v117_v45, 1 }
  0xd7   :  { %v119_v47 = vadd.f32 %v118_v46, %v117_v45 }
  0xd9   :  { %147 = vpush %v119_v47 }
 0x10a   :  { %s148_s4 = spop %147 }
 0x10b   :  { %s128_s5 = smul.f32 0.001953125, %s148_s4 }
 0x10d   :  { %130 = sst [smem:[#allocation8]] %s128_s5 }
 0x10e   :  { %206 = shalt.err (!%p203_p4)
}
 0x10f   :  { %s216_s12 = smov [#allocation8]  }
 0x110   :  { %138 = dma.smem_to_hbm %s216_s12, 16, %s342_s10, [#allocation5]  }
 0x111   :  { %211 = dma.done.wait [#allocation5], 16  }
 0x112   :  { %212 = vsyncadd [#allocation5], 4294967280 }
 0x113   :  { %142 = sfence }
 0x114   :  { %143 = vsyncpa [#allocation4], 1 }
 0x115   :  { %144 = vsyncpa [#allocation7], 1 }
 0x116   :  { %145 = vsyncpa [#allocation5], 1 }

</bundles_post_ra>
